<compile_context>
chip_gen: v7x
topology: tpu7x:2x2x1
jax: 0.10.0
libtpu: 0.0.40
codegen_flags: <defaults>
</compile_context>

<pallas_src>
import math

import numpy as np
import jax
import jax.numpy as jnp
from jax.experimental import pallas as pl
from jax.experimental.pallas import tpu as pltpu


def _round_up(n: int, m: int) -> int:
    return ((n + m - 1) // m) * m


def _sin_pos_emb_kernel(x_ref, freq_ref, phase_ref, out_ref):
    # x_ref:     (TB, 1)   f32  timesteps
    # freq_ref:  (1, dim)  f32  [scale*f_0..scale*f_{h-1}, scale*f_0..scale*f_{h-1}]
    # phase_ref: (1, dim)  f32  [0..0, pi/2..pi/2]   (cos(t) == sin(t + pi/2))
    # out_ref:   (TB, dim)
    # One broadcast multiply + add (VALU slack) + one fused, lane-dense sin
    # over the full row; single full-width store, no lane-axis concat.
    args = x_ref[...] * freq_ref[...] + phase_ref[...]
    out_ref[...] = jnp.sin(args).astype(out_ref.dtype)


def sinusoidal_pos_emb(x: jax.Array,
                       dim: int,
                       scale: float = 1000.0,
                       *,
                       block_rows: int = 1024,
                       out_dtype=jnp.float32) -> jax.Array:
    """x: (B,) float array of timesteps -> (B, dim) sinusoidal embedding.

    block_rows: keep >= 512-1024 in production (tiny tiles are test-only).
    out_dtype:  jnp.bfloat16 halves HBM writeback on v5e/v6e if downstream
                consumes bf16; the sin argument is always computed in f32.
    """
    assert dim % 2 == 0, "dim must be even"
    half_dim = dim // 2
    assert half_dim >= 2, "dim must be >= 4 (log(10000)/(half_dim-1))"

    B = x.shape[0]

    # Trace-time constants with `scale` folded in (no in-kernel exp, no
    # per-row recompute on the single EUP slot).
    log_coef = math.log(10000.0) / (half_dim - 1)
    f = (float(scale)
         * np.exp(np.arange(half_dim, dtype=np.float64) * -log_coef)
         ).astype(np.float32)
    freq_full = jnp.asarray(np.concatenate([f, f]).reshape(1, dim))
    phase = jnp.asarray(
        np.concatenate([np.zeros(half_dim, np.float32),
                        np.full(half_dim, np.pi / 2.0, np.float32)]
                       ).reshape(1, dim))

    # Batch tile: multiple of 8 sublanes.  Ensure >= 2 grid steps when B > 8
    # so the "parallel" axis shards across v7x's two TensorCores.
    TB = min(int(block_rows), _round_up(B, 8))
    if B > 8:
        TB = min(TB, max(8, _round_up(pl.cdiv(B, 2), 8)))
    TB = max(8, _round_up(TB, 8))

    x2d = x.astype(jnp.float32).reshape(B, 1)

    # Exact (B, dim) output; ragged tail block writeback is masked by Pallas
    # (no padding, no post-call slice / extra HBM copy).
    out = pl.pallas_call(
        _sin_pos_emb_kernel,
        out_shape=jax.ShapeDtypeStruct((B, dim), out_dtype),
        grid=(pl.cdiv(B, TB),),
        in_specs=[
            pl.BlockSpec((TB, 1), lambda i: (i, 0)),
            pl.BlockSpec((1, dim), lambda i: (0, 0)),
            pl.BlockSpec((1, dim), lambda i: (0, 0)),
        ],
        out_specs=pl.BlockSpec((TB, dim), lambda i: (i, 0)),
        compiler_params=pltpu.CompilerParams(
            dimension_semantics=("parallel",)),
    )(x2d, freq_full, phase)
    return out


def _reference(x, dim, scale=1000.0):
    # Faithful f32 translation of the PyTorch forward.
    half_dim = dim // 2
    emb = math.log(10000.0) / (half_dim - 1)
    emb = jnp.exp(jnp.arange(half_dim, dtype=jnp.float32) * -emb)
    emb = scale * x[:, None].astype(jnp.float32) * emb[None, :]
    return jnp.concatenate([jnp.sin(emb), jnp.cos(emb)], axis=-1)


if __name__ == "__main__":
    key = jax.random.PRNGKey(0)

    # Small shape consistent with the module: batch of timesteps, dim=32.
    B, dim = 8, 32
    x = jax.random.uniform(key, (B,), dtype=jnp.float32)
    out = jax.block_until_ready(sinusoidal_pos_emb(x, dim, scale=1000.0))
    ref = _reference(x, dim, scale=1000.0)
    assert out.shape == (B, dim)
    # Folding `scale` into the f32 frequency constant reassociates the
    # argument (x*(scale*f) vs (scale*x)*f), and cos = sin(t + pi/2) adds
    # ~1 ulp of the (large, ~1e3 rad) argument -> compare with 1e-3 tol.
    assert jnp.allclose(out, ref, atol=1e-3, rtol=1e-3), "mismatch vs reference"

    # Ragged batch (B % TB != 0), >= 2 grid steps, lane-dense dim >= 128.
    B2, dim2 = 20, 256
    x2 = jax.random.uniform(jax.random.PRNGKey(1), (B2,), dtype=jnp.float32)
    out2 = jax.block_until_ready(sinusoidal_pos_emb(x2, dim2, scale=1000.0))
    ref2 = _reference(x2, dim2, scale=1000.0)
    assert out2.shape == (B2, dim2)
    assert jnp.allclose(out2, ref2, atol=1e-3, rtol=1e-3), "mismatch (ragged)"

    # bf16-output path (writeback halving on v5e/v6e); args stay f32.
    out3 = jax.block_until_ready(
        sinusoidal_pos_emb(x2, dim2, scale=1000.0, out_dtype=jnp.bfloat16))
    assert out3.dtype == jnp.bfloat16
    assert jnp.allclose(out3.astype(jnp.float32), ref2, atol=2e-2, rtol=2e-2), \
        "mismatch (bf16 output)"

    print("KERNEL_OK")
</pallas_src>

<mosaic_0001>
module attributes {stable_mosaic.version = 11 : i64} {
  func.func @_sin_pos_emb_kernel(%arg0: i32, %arg1: memref<8x1xf32, #tpu.memory_space<vmem>>, %arg2: memref<1x32xf32, #tpu.memory_space<vmem>>, %arg3: memref<1x32xf32, #tpu.memory_space<vmem>>, %arg4: memref<8x32xf32, #tpu.memory_space<vmem>>) attributes {dimension_semantics = [#tpu.dimension_semantics<parallel>], iteration_bounds = array<i64: 1>, scalar_prefetch = 0 : i64, scratch_operands = 0 : i64, tpu.core_type = #tpu.core_type<tc>, window_params = [{transform_indices = @transform_0, window_bounds = array<i64: 8, 1>}, {pipeline_mode = #tpu.pipeline_mode<synchronous>, transform_indices = @transform_1, window_bounds = array<i64: 1, 32>}, {pipeline_mode = #tpu.pipeline_mode<synchronous>, transform_indices = @transform_2, window_bounds = array<i64: 1, 32>}, {transform_indices = @transform_3, window_bounds = array<i64: 8, 32>}]} {
    %c0 = arith.constant 0 : index
    %c0_0 = arith.constant 0 : index
    %0 = vector.load %arg1[%c0, %c0_0] : memref<8x1xf32, #tpu.memory_space<vmem>>, vector<8x1xf32>
    %c0_1 = arith.constant 0 : index
    %c0_2 = arith.constant 0 : index
    %1 = vector.load %arg2[%c0_1, %c0_2] : memref<1x32xf32, #tpu.memory_space<vmem>>, vector<1x32xf32>
    %2 = vector.broadcast %0 : vector<8x1xf32> to vector<8x32xf32>
    %3 = vector.broadcast %1 : vector<1x32xf32> to vector<8x32xf32>
    %4 = arith.mulf %2, %3 : vector<8x32xf32>
    %c0_3 = arith.constant 0 : index
    %c0_4 = arith.constant 0 : index
    %5 = vector.load %arg3[%c0_3, %c0_4] : memref<1x32xf32, #tpu.memory_space<vmem>>, vector<1x32xf32>
    %6 = vector.broadcast %5 : vector<1x32xf32> to vector<8x32xf32>
    %7 = arith.addf %4, %6 : vector<8x32xf32>
    %8 = math.sin %7 : vector<8x32xf32>
    %c0_5 = arith.constant 0 : index
    %c0_6 = arith.constant 0 : index
    %9 = vector.load %arg4[%c0_5, %c0_6] : memref<8x32xf32, #tpu.memory_space<vmem>>, vector<8x32xf32>
    tpu.vector_store %arg4[%c0_5, %c0_6], %8 {strides = array<i32>} : memref<8x32xf32, #tpu.memory_space<vmem>>, vector<8x32xf32>,
    return
  }
  func.func @transform_0(%arg0: i32) -> (i32, i32) {
    %c0_i32 = arith.constant 0 : i32
    %c0_i32_0 = arith.constant 0 : i32
    return %arg0, %c0_i32 : i32, i32
  }
  func.func @transform_1(%arg0: i32) -> (i32, i32) {
    %c0_i32 = arith.constant 0 : i32
    %c0_i32_0 = arith.constant 0 : i32
    %c0_i32_1 = arith.constant 0 : i32
    return %c0_i32, %c0_i32_0 : i32, i32
  }
  func.func @transform_2(%arg0: i32) -> (i32, i32) {
    %c0_i32 = arith.constant 0 : i32
    %c0_i32_0 = arith.constant 0 : i32
    %c0_i32_1 = arith.constant 0 : i32
    return %c0_i32, %c0_i32_0 : i32, i32
  }
  func.func @transform_3(%arg0: i32) -> (i32, i32) {
    %c0_i32 = arith.constant 0 : i32
    %c0_i32_0 = arith.constant 0 : i32
    return %arg0, %c0_i32 : i32, i32
  }
}

</mosaic_0001>

<bundles_post_ra>
// kernel: tpu_custom_call.1
= control target key start
LH: loop header
LB: loop body
LE: loop exit
PB: predicated region body
PF: predicated region fallthrough
CT: control target
= control target key end

     0   :  { %v204_v1 = vmov 0   ;;  %s274_s0 = inlined_call_operand.vmem [shape: f32[8,1], index: 0, kind: input, shape index: {}]   ;;  %s275_s1 = inlined_call_operand.vmem [shape: f32[1,32], index: 1, kind: input, shape index: {}]   ;;  %s276_s2 = inlined_call_operand.vmem [shape: f32[1,32], index: 2, kind: input, shape index: {}]   ;;  %s277_s3 = inlined_call_operand.hbm [shape: f32[8,32], index: 3, kind: output, shape index: {}]  }
   0x1   :  { %v15_v0 = vld [vmem:[%s274_s0] sm:$0xff]  ;;  %175 = vset.pattern.permute.xlu0 %v204_v1 }
   0x2   :  { %19 = vperm.xlu0 %175, %v15_v0  }
   0x3   :  { %8 = vsyncpa [#allocation3], 0  ;;  %v157_v2 = vld [vmem:[%s275_s1] ss:$0 sm:$0xff]  ;;  %v205_v18 = vmov 2102212464  }
   0x4   :  { %v158_v3 = vld [vmem:[%s276_s2] ss:$0 sm:$0xff]  ;;  %v206_v20 = vmov 920167782   ;;  %v207_v24 = vmov 1326507024  }
   0x5   :  { %v208_v26 = vmov 683565275   ;;  %v209_v28 = vmov 2475754826   ;;  %v210_v31 = vmov 2131351028  }
   0x6   :  { %s211_s0 = smov [#allocation2]   ;;  %vm141_vm12 = vcmask 261120  }
   0x7   :  { %s149_s1 = sshll.u32 %s211_s0, 4  ;;  %s150_s1 = int_to_ptr.vmem [resolvable:$true] %s149_s1 }
   0x8   :  { %s180_s2 = scalar_lea.vmem %s150_s1, 128  ;;  %p185_p1 = scmp.lt.s32.totalorder %s150_s1, %s150_s1 }
   0x9   :  { %p181_p0 = scmp.ne.s32.totalorder %s150_s1, %s180_s2  ;;  %p186_p2 = scmp.lt.s32.totalorder %s180_s2, %s180_s2 }
   0xb   :  { %p187_p3 = por %p186_p2, %p185_p1 }
   0xd   :  { %p188_p4 = pnand %p187_p3, %p181_p0 }
  0x81   :  { %v20_v4 = vpop.permute.xlu0 %19 }
  0x82   :  { %v28_v5 = vmul.f32 %v157_v2, %v20_v4 }
  0x84   :  { %v241_v6 = vadd.f32 %v158_v3, %v28_v5 }
  0x86   :  { %v40_v7 = vand.u32 2139095040, %v241_v6  ;;  %v37_v8 = vand.u32 2147483647, %v241_v6  ;;  %vm39_vm7 = vcmp.lt.s32.totalorder %v241_v6, 0  ;;  %vm129_vm13 = vweird.f32 %v241_v6 }
  0x88   :  { %v41_v9 = vshrl.u32 %v40_v7, 23  ;;  %v44_v11 = vand.u32 8388607, %v37_v8  ;;  %vm38_vm8 = vcmp.le.f32.partialorder %v37_v8, 0.7853982 }
  0x8a   :  { %v159_v10 = vadd.s32 4294967169, %v41_v9  ;;  %v45_v14 = vor.u32 8388608, %v44_v11 }
  0x8c   :  { %v47_v12 = vadd.s32 1, %v159_v10  ;;  %v85_v22 = vshll.u32 %v45_v14, 8 }
  0x8e   :  { %vm48_vm0 = vcmp.gt.s32.totalorder %v47_v12, 0 }
  0x8f   :  { %v49_v13 = vsel %vm48_vm0, %v47_v12, 0 }
  0x90   :  { %v51_v15 = vand.u32 31, %v49_v13  ;;  %v50_v16 = vshrl.u32 %v49_v13, 5 }
  0x92   :  { %v52_v17 = vsub.s32 32, %v51_v15  ;;  %v63_v19 = vshll.u32 %v205_v18, %v51_v15  ;;  %v66_v21 = vshll.u32 %v206_v20, %v51_v15  ;;  %v54_v27 = vshll.u32 %v208_v26, %v51_v15 }
  0x93   :  { %v57_v30 = vshll.u32 %v209_v28, %v51_v15  ;;  %v60_v33 = vshll.u32 %v210_v31, %v51_v15  ;;  %vm72_vm1 = vcmp.lt.s32.totalorder %v50_v16, 4  ;;  %vm69_vm2 = vcmp.lt.s32.totalorder %v50_v16, 1 }
  0x94   :  { %v64_v23 = vshrl.u32 %v206_v20, %v52_v17  ;;  %v67_v25 = vshrl.u32 %v207_v24, %v52_v17  ;;  %v55_v29 = vshrl.u32 %v209_v28, %v52_v17  ;;  %v58_v32 = vshrl.u32 %v210_v31, %v52_v17 }
  0x95   :  { %v61_v34 = vshrl.u32 %v205_v18, %v52_v17  ;;  %v53_v38 = vshrl.u32 %v208_v26, %v52_v17  ;;  %vm70_vm3 = vcmp.lt.s32.totalorder %v50_v16, 2  ;;  %vm71_vm4 = vcmp.lt.s32.totalorder %v50_v16, 3 }
  0x96   :  { %v65_v35 = vor.u32 %v64_v23, %v63_v19  ;;  %v68_v36 = vor.u32 %v67_v25, %v66_v21  ;;  %v56_v37 = vor.u32 %v55_v29, %v54_v27  ;;  %v59_v39 = vor.u32 %v58_v32, %v57_v30 }
  0x97   :  { %v62_v40 = vor.u32 %v61_v34, %v60_v33 }
  0x98   :  { %v78_v41 = vsel %vm72_vm1, %v65_v35, 920167782  ;;  %v82_v42 = vsel %vm72_vm1, %v68_v36, 1326507024  ;;  %v77_v44 = vsel %vm69_vm2, %v56_v37, %v59_v39  ;;  %v73_v47 = vsel %vm69_vm2, %v53_v38, %v56_v37 }
  0x99   :  { %v74_v43 = vsel %vm72_vm1, %v62_v40, 2102212464  ;;  %v79_v45 = vsel %vm71_vm4, %v62_v40, %v78_v41  ;;  %v81_v46 = vsel %vm69_vm2, %v59_v39, %v62_v40  ;;  %v83_v50 = vsel %vm71_vm4, %v65_v35, %v82_v42 }
  0x9a   :  { %v75_v48 = vsel %vm71_vm4, %v59_v39, %v74_v43  ;;  %v80_v49 = vsel %vm70_vm3, %v77_v44, %v79_v45  ;;  %v84_v51 = vsel %vm70_vm3, %v81_v46, %v83_v50 }
  0x9b   :  { %v247_v52 = vmul.u32.u64.low %v85_v22, %v80_v49  ;;  %v248_v53 = vmul.u32.u64.high %v85_v22, %v80_v49, %v247_v52  ;;  %v250_v54 = vmul.u32.u64.low %v85_v22, %v84_v51  ;;  %v251_v55 = vmul.u32.u64.high %v85_v22, %v84_v51, %v250_v54 }
  0x9c   :  { %v76_v56 = vsel %vm70_vm3, %v73_v47, %v75_v48 }
  0x9d   :  { %v95_v57 = vadd.s32 1, %v248_v53  ;;  %v92_v58 = vmul.u32 %v85_v22, %v76_v56  ;;  %vm94_vm5 = vc.u32 %v251_v55, %v247_v52  ;;  %v93_v7 = vadd.s32 %v247_v52, %v251_v55 }
  0x9f   :  { %v96_v59 = vsel %vm94_vm5, %v95_v57, %v248_v53 }
  0xa0   :  { %v97_v60 = vadd.s32 %v96_v59, %v92_v58 }
  0xa2   :  { %v98_v61 = vadd.s32 536870912, %v97_v60 }
  0xa4   :  { %v99_v62 = vshrl.u32 %v98_v61, 30 }
  0xa6   :  { %v100_v63 = vshll.u32 %v99_v62, 30  ;;  %v123_v20 = vsub.s32 4, %v99_v62 }
  0xa8   :  { %v101_v0 = vsub.s32 %v97_v60, %v100_v63  ;;  %v124_v23 = vsel %vm39_vm7, %v123_v20, %v99_v62 }
  0xa9   :  { %v126_v25 = vsel %vm38_vm8, 0, %v124_v23 }
  0xaa   :  { %v103_v1 = vsub.s32 0, %v101_v0  ;;  %v130_v26 = vadd.s32 3, %v126_v25 }
  0xac   :  { %v160_v2 = vmin.u32 %v103_v1, %v101_v0  ;;  %v131_v27 = vand.u32 3, %v130_v26 }
  0xae   :  { %v105_v3 = vclz %v160_v2  ;;  %vm136_vm9 = vcmp.eq.s32.totalorder %v131_v27, 2  ;;  %vm133_vm10 = vcmp.eq.s32.totalorder %v131_v27, 0  ;;  %vm132_vm11 = vcmp.lt.s32.totalorder %v131_v27, 2 }
  0xb0   :  { %v161_v4 = vadd.s32 4294967294, %v105_v3 }
  0xb2   :  { %vm162_vm6 = vcmp.lt.s32.totalorder %v161_v4, 0 }
  0xb3   :  { %v108_v5 = vsel %vm162_vm6, 0, %v161_v4 }
  0xb4   :  { %v109_v9 = vsub.s32 32, %v108_v5  ;;  %v113_v10 = vsub.s32 4294967266, %v108_v5  ;;  %v110_v11 = vshll.u32 %v101_v0, %v108_v5 }
  0xb6   :  { %v111_v12 = vshrl.u32 %v93_v7, %v109_v9  ;;  %v114_v13 = vadd.s32 127, %v113_v10 }
  0xb8   :  { %v112_v14 = vor.u32 %v111_v12, %v110_v11  ;;  %v115_v15 = vshll.u32 %v114_v13, 23 }
  0xba   :  { %v116_v16 = vor.u32 4788187, %v115_v15  ;;  %v119_v18 = vcvt.s32.f32 %v112_v14 }
  0xbc   :  { %v117_v17 = vand.u32 2147483647, %v116_v16 }
  0xbe   :  { %v120_v19 = vmul.f32 %v119_v18, %v117_v17 }
  0xc0   :  { %v121_v21 = vxor.u32 2147483648, %v120_v19 }
  0xc2   :  { %v122_v22 = vsel %vm39_vm7, %v121_v21, %v120_v19 }
  0xc3   :  { %v125_v24 = vsel %vm38_vm8, %v241_v6, %v122_v22 }
  0xc4   :  { %176 = vcosq.f32 %v125_v24 }
  0xc5   :  { %178 = vsinq.f32 %v125_v24 }
  0xce   :  { %v177_v28 = vpop.eup %176 }
  0xcf   :  { %v179_v29 = vpop.eup %178  ;;  %v137_v30 = vxor.u32 2147483648, %v177_v28 }
  0xd0   :  { %v134_v31 = vxor.u32 2147483648, %v179_v29 }
  0xd1   :  { %v138_v32 = vsel %vm136_vm9, %v137_v30, %v179_v29 }
  0xd2   :  { %v135_v8 = vsel %vm133_vm10, %v177_v28, %v134_v31 }
  0xd3   :  { %v139_v33 = vsel %vm132_vm11, %v135_v8, %v138_v32 }
  0xd4   :  { %v140_v34 = vsel %vm129_vm13, nan, %v139_v33 }
  0xd5   :  { %142 = vst.msk [vmem:[#allocation2] sm:$0xff] %vm141_vm12, %v140_v34 }
  0xd6   :  { %191 = shalt.err (!%p188_p4)
}
  0xd7   :  { %s192_s20 = scalar_lea.hbm %s277_s3, 128 }
  0xd8   :  { %p193_p5 = scmp.ne.s32.totalorder %s277_s3, %s192_s20  ;;  %p196_p6 = scmp.lt.u32.totalorder %s192_s20, %s277_s3 }
  0xda   :  { %p198_p7 = pnand %p196_p6, %p193_p5 }
  0xdc   :  { %201 = shalt.err (!%p198_p7)
}
  0xdd   :  { %152 = dma.vmem_to_hbm [thread:$0]  %s150_s1, 128, %s277_s3, [#allocation3]  }
  0xde   :  { %202 = dma.done.wait [#allocation3], 128  }
  0xdf   :  { %203 = vsyncadd [#allocation3], 4294967168 }
  0xe0   :  { %156 = vsyncpa [#allocation3], 1 }

</bundles_post_ra>
